<compile_context>
chip_gen: v7x
topology: tpu7x:2x2x1
jax: 0.10.0
libtpu: 0.0.40
codegen_flags: <defaults>
</compile_context>

<pallas_src>
import math
import numpy as np
import jax
import jax.numpy as jnp
from jax.experimental import pallas as pl
from jax.experimental.pallas import tpu as pltpu


# -----------------------------------------------------------------------------
# Stage 1: block-mask kernel (separable max-pool, tb batch elements per step)
#          with fused global-count -> scale finalization.
# -----------------------------------------------------------------------------
def _make_pool_kernel(block_size: int, H: int, W: int, total_elems: float):
    def kernel(mpad_ref, bm_ref, scale_ref):
        # mpad_ref:  (tb, H+2p, W+2p) zero-padded bernoulli seed mask (f32)
        # bm_ref:    (tb, H, W)       block_mask = 1 - maxpool(mask)
        # scale_ref: (1, 1)           accumulated count, finalized to scale
        m = mpad_ref[...]
        # Separable max-pool: 2*(bs-1) maxima instead of bs^2-1.
        rowmax = m[:, 0:H, :]
        for di in range(1, block_size):
            rowmax = jnp.maximum(rowmax, m[:, di:di + H, :])
        # Taking exactly the first HxW outputs reproduces the PyTorch
        # [:-1, :-1] crop for even block sizes.
        pooled = rowmax[:, :, 0:W]
        for dj in range(1, block_size):
            pooled = jnp.maximum(pooled, rowmax[:, :, dj:dj + W])
        bm = (1.0 - pooled).astype(jnp.float32)
        bm_ref[...] = bm

        # Fused normalization: accumulate the global keep-count across the
        # grid, then finalize to scale = numel / max(count, 1) on the last step.
        @pl.when(pl.program_id(0) == 0)
        def _():
            scale_ref[...] = jnp.zeros_like(scale_ref)

        scale_ref[...] += jnp.sum(bm)

        @pl.when(pl.program_id(0) == pl.num_programs(0) - 1)
        def _():
            # NOTE: max(count, 1) guards the all-dropped case; the PyTorch
            # reference would return inf/nan there (intentional difference).
            scale_ref[...] = (jnp.float32(total_elems)
                              / jnp.maximum(scale_ref[...], 1.0))

    return kernel


# -----------------------------------------------------------------------------
# Stage 2: streaming apply kernel: out = x * block_mask * scale.
# -----------------------------------------------------------------------------
def _apply_mask_kernel(scale_smem, x_ref, m_ref, o_ref):
    # scale_smem: (1,1) f32 in SMEM; x_ref: (1,tc,LW); m_ref: (1,1,LW) f32.
    s = scale_smem[0, 0]
    o_ref[...] = (x_ref[...] * (m_ref[...] * s)).astype(o_ref.dtype)


def _vmem_budgets():
    """(stage-2 x-tile byte budget, vmem_limit_bytes) per TPU generation."""
    try:
        kind = jax.devices()[0].device_kind.lower()
    except Exception:
        kind = ""
    if ("v2" in kind) or ("v3" in kind):
        return 2 * 1024 * 1024, None                 # tiny-VMEM parts: defaults
    if ("v4" in kind) or ("v5" in kind) or ("v6" in kind):
        return 8 * 1024 * 1024, 64 * 1024 * 1024     # 128 MiB physical VMEM
    # v7x (64 MiB per TensorCore) or unknown: stay conservative.
    return 5 * 1024 * 1024, 32 * 1024 * 1024


def _pick_channel_tile(C: int, row_bytes: int, itemsize: int,
                       budget_bytes: int) -> int:
    """Largest legal channel tile whose x-block fits the byte budget."""
    if C * row_bytes <= budget_bytes:
        return C                                     # full dim: always legal
    sub = max(8, 32 // max(itemsize, 1))             # dtype-packed sublane align
    for align in (sub, 8):
        cand = [t for t in range(align, C, align)
                if C % t == 0 and t * row_bytes <= budget_bytes]
        if cand:
            return max(cand)
    # No aligned divisor fits the (soft) budget: smallest 8-aligned divisor
    # keeps the block shape legal even if it overshoots the budget.
    cand = [t for t in range(8, C, 8) if C % t == 0]
    if cand:
        return min(cand)
    return C   # last resort: full-dim block is always a legal block shape


def dropblock2d_pallas(x, mask, block_size: int):
    """DropBlock2D training-mode forward. x: (N,C,H,W), mask: (N,H,W) f32."""
    N, C, H, W = x.shape
    HW = H * W
    pad = block_size // 2
    Hp, Wp = H + 2 * pad, W + 2 * pad

    # Zero-pad the bernoulli seed mask (tiny layout glue).
    mask_pad = jnp.pad(mask.astype(jnp.float32),
                       ((0, 0), (pad, pad), (pad, pad)))

    # ---- Stage 1: block_mask + fused scale, batched over N ----
    tb = max(t for t in range(1, min(N, 8) + 1) if N % t == 0)
    block_mask, scale = pl.pallas_call(
        _make_pool_kernel(block_size, H, W, float(N * H * W)),
        out_shape=(jax.ShapeDtypeStruct((N, H, W), jnp.float32),
                   jax.ShapeDtypeStruct((1, 1), jnp.float32)),
        grid=(N // tb,),
        in_specs=[pl.BlockSpec((tb, Hp, Wp), lambda n: (n, 0, 0))],
        out_specs=(pl.BlockSpec((tb, H, W), lambda n: (n, 0, 0)),
                   pl.BlockSpec((1, 1), lambda n: (0, 0))),
        compiler_params=pltpu.CompilerParams(
            dimension_semantics=("arbitrary",)),     # scale is an accumulator
    )(mask_pad)

    # ---- Lane folding: make the streaming lane width a multiple of 128 ----
    g = 1
    if HW % 128 != 0:
        r = 128 // math.gcd(HW, 128)
        if C % r == 0:
            g = r
    Cg, LW = C // g, g * HW

    x3 = x.reshape(N, Cg, LW)                        # free contiguous reshape
    m3 = block_mask.reshape(N, 1, HW)
    if g > 1:
        m3 = jnp.tile(m3, (1, 1, g))                 # C/g x smaller than x traffic

    # ---- Stage 2: lane-dense streaming multiply, tiled over (N, C//g) ----
    itemsize = jnp.dtype(x.dtype).itemsize
    budget, vmem_limit = _vmem_budgets()
    tc = _pick_channel_tile(Cg, LW * itemsize, itemsize, budget)
    # v7x has 2 TensorCores sharded over the parallel grid axes: expose >= 2
    # steps when the whole problem would otherwise be a single grid point.
    if N * (Cg // tc) < 2 and tc % 2 == 0 and (tc // 2) % 8 == 0:
        tc //= 2

    out3 = pl.pallas_call(
        _apply_mask_kernel,
        out_shape=jax.ShapeDtypeStruct((N, Cg, LW), x.dtype),
        grid=(N, Cg // tc),
        in_specs=[
            pl.BlockSpec(memory_space=pltpu.MemorySpace.SMEM),   # scale (1,1)
            pl.BlockSpec((1, tc, LW), lambda n, c: (n, c, 0)),   # x tile
            # mask index_map ignores c -> same block stays VMEM-resident over C
            pl.BlockSpec((1, 1, LW), lambda n, c: (n, 0, 0)),
        ],
        out_specs=pl.BlockSpec((1, tc, LW), lambda n, c: (n, c, 0)),
        compiler_params=pltpu.CompilerParams(
            dimension_semantics=("parallel", "parallel"),
            vmem_limit_bytes=vmem_limit),
    )(scale, x3, m3)

    return out3.reshape(N, C, H, W)


class DropBlock2D:
    """JAX/Pallas port of miguelvr DropBlock2D (forward only)."""

    def __init__(self, drop_prob: float, block_size: int):
        self.drop_prob = float(drop_prob)
        self.block_size = int(block_size)
        self.training = True

    def __call__(self, x, key):
        if (not self.training) or self.drop_prob == 0.0:
            return x
        gamma = self.drop_prob / (self.block_size ** 2)
        N, C, H, W = x.shape
        mask = (jax.random.uniform(key, (N, H, W)) < gamma).astype(jnp.float32)
        return dropblock2d_pallas(x, mask, self.block_size)


class LinearScheduler:
    """Mirror of the PyTorch LinearScheduler: forward delegates to dropblock."""

    def __init__(self, dropblock, start_value, stop_value, nr_steps):
        self.dropblock = dropblock
        self.i = 0
        self.drop_values = np.linspace(start=start_value, stop=stop_value,
                                       num=int(nr_steps))

    def __call__(self, x, key):
        return self.dropblock(x, key)

    def step(self):
        # TODO(synk): host-side Python state (drop_prob annealing) — not a kernel op.
        if self.i < len(self.drop_values):
            self.dropblock.drop_prob = float(self.drop_values[self.i])
        self.i += 1


def _ref_dropblock(x, mask, bs):
    """Pure-JAX reference of the DropBlock2D training forward."""
    N, C, H, W = x.shape
    pad = bs // 2
    mp = jnp.pad(mask, ((0, 0), (pad, pad), (pad, pad)))
    pooled = jnp.zeros((N, H, W), jnp.float32)
    for di in range(bs):
        for dj in range(bs):
            pooled = jnp.maximum(pooled, mp[:, di:di + H, dj:dj + W])
    bm = 1.0 - pooled
    cnt = jnp.maximum(jnp.sum(bm), 1.0)   # same divide-by-zero guard as kernel
    return x * bm[:, None, :, :] * (bm.size / cnt)


if __name__ == "__main__":
    key = jax.random.PRNGKey(0)
    kx, kmask, kx2, kmask2 = jax.random.split(key, 4)

    # Small shapes consistent with the module's NCHW conv-feature input.
    N, C, H, W = 2, 4, 16, 16
    x = jax.random.normal(kx, (N, C, H, W), dtype=jnp.float32)

    # No learnable parameters in LinearScheduler / DropBlock2D.
    sched = LinearScheduler(DropBlock2D(drop_prob=0.0, block_size=3),
                            start_value=0.0, stop_value=0.25, nr_steps=5)
    for _ in range(5):            # anneal so drop_prob > 0 and the kernel does work
        sched.step()

    out = jax.block_until_ready(sched(x, kmask))

    bs = sched.dropblock.block_size
    gamma = sched.dropblock.drop_prob / (bs ** 2)
    mask = (jax.random.uniform(kmask, (N, H, W)) < gamma).astype(jnp.float32)
    ref = _ref_dropblock(x, mask, bs)
    assert jnp.allclose(out, ref, atol=1e-5, rtol=1e-5)

    # Second check: H*W not a multiple of 128 exercises the channel->lane fold.
    N2, C2, H2, W2 = 2, 32, 14, 14
    x2 = jax.random.normal(kx2, (N2, C2, H2, W2), dtype=jnp.float32)
    mask2 = (jax.random.uniform(kmask2, (N2, H2, W2)) < gamma).astype(jnp.float32)
    out2 = jax.block_until_ready(dropblock2d_pallas(x2, mask2, bs))
    ref2 = _ref_dropblock(x2, mask2, bs)
    assert jnp.allclose(out2, ref2, atol=1e-5, rtol=1e-5)

    print("KERNEL_OK")
</pallas_src>

<mosaic_0001>
module attributes {stable_mosaic.version = 11 : i64} {
  func.func @kernel(%arg0: i32, %arg1: memref<2x18x18xf32, #tpu.memory_space<vmem>>, %arg2: memref<2x16x16xf32, #tpu.memory_space<vmem>>, %arg3: memref<1x1xf32, #tpu.memory_space<vmem>>) attributes {dimension_semantics = [#tpu.dimension_semantics<arbitrary>], iteration_bounds = array<i64: 1>, scalar_prefetch = 0 : i64, scratch_operands = 0 : i64, tpu.core_type = #tpu.core_type<tc>, window_params = [{transform_indices = @transform_0, window_bounds = array<i64: 2, 18, 18>}, {transform_indices = @transform_1, window_bounds = array<i64: 2, 16, 16>}, {pipeline_mode = #tpu.pipeline_mode<synchronous>, transform_indices = @transform_2, window_bounds = array<i64: 1, 1>}]} {
    %c0 = arith.constant 0 : index
    %c0_0 = arith.constant 0 : index
    %c0_1 = arith.constant 0 : index
    %0 = vector.load %arg1[%c0, %c0_0, %c0_1] : memref<2x18x18xf32, #tpu.memory_space<vmem>>, vector<2x18x18xf32>
    %1 = vector.extract_strided_slice %0 {offsets = [0, 0, 0], sizes = [2, 16, 18], strides = [1, 1, 1]} : vector<2x18x18xf32> to vector<2x16x18xf32>
    %2 = vector.extract_strided_slice %0 {offsets = [0, 1, 0], sizes = [2, 16, 18], strides = [1, 1, 1]} : vector<2x18x18xf32> to vector<2x16x18xf32>
    %3 = arith.maximumf %1, %2 : vector<2x16x18xf32>
    %4 = vector.extract_strided_slice %0 {offsets = [0, 2, 0], sizes = [2, 16, 18], strides = [1, 1, 1]} : vector<2x18x18xf32> to vector<2x16x18xf32>
    %5 = arith.maximumf %3, %4 : vector<2x16x18xf32>
    %6 = vector.extract_strided_slice %5 {offsets = [0, 0, 0], sizes = [2, 16, 16], strides = [1, 1, 1]} : vector<2x16x18xf32> to vector<2x16x16xf32>
    %7 = vector.extract_strided_slice %5 {offsets = [0, 0, 1], sizes = [2, 16, 16], strides = [1, 1, 1]} : vector<2x16x18xf32> to vector<2x16x16xf32>
    %8 = arith.maximumf %6, %7 : vector<2x16x16xf32>
    %9 = vector.extract_strided_slice %5 {offsets = [0, 0, 2], sizes = [2, 16, 16], strides = [1, 1, 1]} : vector<2x16x18xf32> to vector<2x16x16xf32>
    %10 = arith.maximumf %8, %9 : vector<2x16x16xf32>
    %cst = arith.constant 1.000000e+00 : f32
    %11 = vector.broadcast %cst : f32 to vector<2x16x16xf32>
    %12 = arith.subf %11, %10 : vector<2x16x16xf32>
    %c0_2 = arith.constant 0 : index
    %c0_3 = arith.constant 0 : index
    %c0_4 = arith.constant 0 : index
    %13 = vector.load %arg2[%c0_2, %c0_3, %c0_4] : memref<2x16x16xf32, #tpu.memory_space<vmem>>, vector<2x16x16xf32>
    tpu.vector_store %arg2[%c0_2, %c0_3, %c0_4], %12 {strides = array<i32>} : memref<2x16x16xf32, #tpu.memory_space<vmem>>, vector<2x16x16xf32>,
    %c0_i32 = arith.constant 0 : i32
    %14 = arith.cmpi eq, %arg0, %c0_i32 : i32
    %15 = arith.extui %14 : i1 to i32
    %c0_i32_5 = arith.constant 0 : i32
    %16 = arith.cmpi ne, %15, %c0_i32_5 : i32
    scf.if %16 {
      %cst_13 = arith.constant 0.000000e+00 : f32
      %28 = vector.broadcast %cst_13 : f32 to vector<1x1xf32>
      %c0_14 = arith.constant 0 : index
      %c0_15 = arith.constant 0 : index
      %29 = vector.load %arg3[%c0_14, %c0_15] : memref<1x1xf32, #tpu.memory_space<vmem>>, vector<1x1xf32>
      tpu.vector_store %arg3[%c0_14, %c0_15], %28 {strides = array<i32>} : memref<1x1xf32, #tpu.memory_space<vmem>>, vector<1x1xf32>,
    } else {
    }
    %c0_6 = arith.constant 0 : index
    %c0_7 = arith.constant 0 : index
    %17 = vector.load %arg3[%c0_6, %c0_7] : memref<1x1xf32, #tpu.memory_space<vmem>>, vector<1x1xf32>
    %18 = vector.shape_cast %12 : vector<2x16x16xf32> to vector<1x2x16x16xf32>
    %cst_8 = arith.constant dense<0.000000e+00> : vector<1xf32>
    %19 = vector.multi_reduction <add>, %18, %cst_8 [1, 2, 3] : vector<1x2x16x16xf32> to vector<1xf32>
    %20 = vector.shape_cast %19 : vector<1xf32> to vector<1x1x1x1xf32>
    %21 = vector.extract %20[0, 0, 0, 0] : f32 from vector<1x1x1x1xf32>
    %22 = vector.broadcast %21 : f32 to vector<1x1xf32>
    %23 = arith.addf %17, %22 : vector<1x1xf32>
    %c0_9 = arith.constant 0 : index
    %c0_10 = arith.constant 0 : index
    %24 = vector.load %arg3[%c0_9, %c0_10] : memref<1x1xf32, #tpu.memory_space<vmem>>, vector<1x1xf32>
    tpu.vector_store %arg3[%c0_9, %c0_10], %23 {strides = array<i32>} : memref<1x1xf32, #tpu.memory_space<vmem>>, vector<1x1xf32>,
    %c0_i32_11 = arith.constant 0 : i32
    %25 = arith.cmpi eq, %arg0, %c0_i32_11 : i32
    %26 = arith.extui %25 : i1 to i32
    %c0_i32_12 = arith.constant 0 : i32
    %27 = arith.cmpi ne, %26, %c0_i32_12 : i32
    scf.if %27 {
      %c0_13 = arith.constant 0 : index
      %c0_14 = arith.constant 0 : index
      %28 = vector.load %arg3[%c0_13, %c0_14] : memref<1x1xf32, #tpu.memory_space<vmem>>, vector<1x1xf32>
      %cst_15 = arith.constant 1.000000e+00 : f32
      %29 = vector.broadcast %cst_15 : f32 to vector<1x1xf32>
      %30 = arith.maximumf %28, %29 : vector<1x1xf32>
      %cst_16 = arith.constant 5.120000e+02 : f32
      %31 = vector.broadcast %cst_16 : f32 to vector<1x1xf32>
      %32 = arith.divf %31, %30 : vector<1x1xf32>
      %c0_17 = arith.constant 0 : index
      %c0_18 = arith.constant 0 : index
      %33 = vector.load %arg3[%c0_17, %c0_18] : memref<1x1xf32, #tpu.memory_space<vmem>>, vector<1x1xf32>
      tpu.vector_store %arg3[%c0_17, %c0_18], %32 {strides = array<i32>} : memref<1x1xf32, #tpu.memory_space<vmem>>, vector<1x1xf32>,
    } else {
    }
    return
  }
  func.func @transform_0(%arg0: i32) -> (i32, i32, i32) {
    %c0_i32 = arith.constant 0 : i32
    %c0_i32_0 = arith.constant 0 : i32
    %c0_i32_1 = arith.constant 0 : i32
    return %arg0, %c0_i32, %c0_i32_0 : i32, i32, i32
  }
  func.func @transform_1(%arg0: i32) -> (i32, i32, i32) {
    %c0_i32 = arith.constant 0 : i32
    %c0_i32_0 = arith.constant 0 : i32
    %c0_i32_1 = arith.constant 0 : i32
    return %arg0, %c0_i32, %c0_i32_0 : i32, i32, i32
  }
  func.func @transform_2(%arg0: i32) -> (i32, i32) {
    %c0_i32 = arith.constant 0 : i32
    %c0_i32_0 = arith.constant 0 : i32
    %c0_i32_1 = arith.constant 0 : i32
    return %c0_i32, %c0_i32_0 : i32, i32
  }
}

</mosaic_0001>

<bundles_post_ra>
// kernel: tpu_custom_call.1
= control target key start
LH: loop header
LB: loop body
LE: loop exit
PB: predicated region body
PF: predicated region fallthrough
CT: control target
= control target key end

     0   :  { %8 = vsyncpa [#allocation3], 0  ;;  %vm24_vm0 = vcmask 1046528   ;;  %vm43_vm1 = vcmask 1045504   ;;  %s314_s0 = inlined_call_operand.vmem [shape: f32[2,18,18], index: 0, kind: input, shape index: {}]   ;;  %s315_s1 = inlined_call_operand.hbm [shape: f32[2,16,16], index: 1, kind: output, shape index: {0}]   ;;  %s316_s2 = inlined_call_operand.hbm [shape: f32[1,1], index: 2, kind: output, shape index: {1}]  }
   0x1   :  { %v15_v0 = vld [vmem:[%s314_s0 + $0x18] sm:$0xff]  ;;  %v16_v1 = vld [vmem:[%s314_s0 + $0x20] sm:$0xff]  ;;  %v13_v7 = vld [vmem:[%s314_s0 + $0x8] sm:$0xff] }
   0x2   :  { %v12_v2 = vld [vmem:[%s314_s0] sm:$0xff]  ;;  %v30_v3 = vrot.slane %v15_v0, 1  ;;  %v31_v4 = vrot.slane %v16_v1, 1  ;;  %v49_v5 = vrot.slane %v15_v0, 2  ;;  %v50_v6 = vrot.slane %v16_v1, 2 }
   0x3   :  { %v25_v8 = vrot.slane %v12_v2, 1  ;;  %v26_v9 = vrot.slane %v13_v7, 1  ;;  %v44_v10 = vrot.slane %v12_v2, 2  ;;  %v45_v11 = vrot.slane %v13_v7, 2  ;;  %v14_v12 = vld [vmem:[%s314_s0 + $0x10] sm:$0x3] }
   0x4   :  { %v32_v13 = vsel %vm24_vm0, %v30_v3, %v31_v4  ;;  %v51_v14 = vsel %vm43_vm1, %v49_v5, %v50_v6  ;;  %v28_v15 = vrot.slane %v14_v12, 1  ;;  %v47_v16 = vrot.slane %v14_v12, 2  ;;  %v17_v17 = vld [vmem:[%s314_s0 + $0x28] sm:$0x3] }
   0x5   :  { %9 = vsyncpa [#allocation5], 0  ;;  %v41_v18 = vmax.f32 %v15_v0, %v32_v13  ;;  %v27_v19 = vsel %vm24_vm0, %v25_v8, %v26_v9  ;;  %v46_v20 = vsel %vm43_vm1, %v44_v10, %v45_v11  ;;  %v33_v21 = vrot.slane %v17_v17, 1  ;;  %s231_s21 = smov 127   ;;  %s232_s0 = smov 126  }
   0x6   :  { %v39_v22 = vmax.f32 %v12_v2, %v27_v19  ;;  %v29_v23 = vsel %vm24_vm0, %v26_v9, %v28_v15  ;;  %v52_v24 = vrot.slane %v17_v17, 2  ;;  %v48_v27 = vsel %vm43_vm1, %v45_v11, %v47_v16  ;;  %s234_s22 = smov [#allocation2]  }
   0x7   :  { %v60_v25 = vmax.f32 %v41_v18, %v51_v14  ;;  %v40_v26 = vmax.f32 %v13_v7, %v29_v23  ;;  %v34_v28 = vsel %vm24_vm0, %v31_v4, %v33_v21  ;;  %vm102_vm2 = vcmask 130048   ;;  %s147_s23 = sshll.u32 %s234_s22, 4  ;;  %s148_s23 = int_to_ptr.vmem [resolvable:$true] %s147_s23 }
   0x8   :  { %v58_v29 = vmax.f32 %v39_v22, %v46_v20  ;;  %v42_v30 = vmax.f32 %v16_v1, %v34_v28  ;;  %v53_v32 = vsel %vm43_vm1, %v50_v6, %v52_v24  ;;  %vm111_vm3 = vcmask 0   ;;  %s183_s24 = scalar_lea.vmem %s148_s23, 512  ;;  %p188_p1 = scmp.lt.s32.totalorder %s148_s23, %s148_s23 }
   0x9   :  { %70 = vrot.lane.b32.xlu1 %v60_v25, %s231_s21  ;;  %v59_v31 = vmax.f32 %v40_v26, %v48_v27  ;;  %v233_v61 = vmov 0.0   ;;  %p184_p0 = scmp.ne.s32.totalorder %s148_s23, %s183_s24  ;;  %p189_p2 = scmp.lt.s32.totalorder %s183_s24, %s183_s24 }
   0xa   :  { %66 = vrot.lane.b32.xlu0 %v58_v29, %s231_s21  ;;  %v61_v33 = vmax.f32 %v42_v30, %v53_v32  ;;  %112 = vst.msk [vmem:[#allocation4] sm:$0x1] %vm111_vm3, %v233_v61 }
   0xb   :  { %p190_p3 = por %p189_p2, %p188_p1 }
   0xd   :  { %82 = vrot.lane.b32.xlu1 %v58_v29, %s232_s0  ;;  %p191_p4 = pnand %p190_p3, %p184_p0 }
   0xe   :  { %68 = vrot.lane.b32.xlu0 %v59_v31, %s231_s21 }
  0x11   :  { %72 = vrot.lane.b32.xlu1 %v61_v33, %s231_s21 }
  0x12   :  { %84 = vrot.lane.b32.xlu0 %v59_v31, %s232_s0 }
  0x15   :  { %88 = vrot.lane.b32.xlu1 %v61_v33, %s232_s0 }
  0x16   :  { %86 = vrot.lane.b32.xlu0 %v60_v25, %s232_s0 }
  0x7b   :  { %v71_v34 = vpop.permute.xlu1 %70 }
  0x7c   :  { %v67_v35 = vpop.permute.xlu0 %66  ;;  %v80_v46 = vmax.f32 %v60_v25, %v71_v34 }
  0x7d   :  { %v78_v36 = vmax.f32 %v58_v29, %v67_v35 }
  0x7f   :  { %v83_v37 = vpop.permute.xlu1 %82 }
  0x80   :  { %v94_v38 = vmax.f32 %v78_v36, %v83_v37  ;;  %v69_v39 = vpop.permute.xlu0 %68 }
  0x81   :  { %v79_v41 = vmax.f32 %v59_v31, %v69_v39 }
  0x82   :  { %v98_v40 = vsub.f32 1.0, %v94_v38 }
  0x83   :  { %v73_v42 = vpop.permute.xlu1 %72 }
  0x84   :  { %103 = vst.msk [vmem:[#allocation2] sm:$0xff] %vm102_vm2, %v98_v40  ;;  %v81_v43 = vmax.f32 %v61_v33, %v73_v42  ;;  %v85_v44 = vpop.permute.xlu0 %84  ;;  %v114_v54 = vsel %vm102_vm2, %v98_v40, 0.0 }
  0x85   :  { %v95_v45 = vmax.f32 %v79_v41, %v85_v44 }
  0x87   :  { %v99_v47 = vsub.f32 1.0, %v95_v45  ;;  %v89_v48 = vpop.permute.xlu1 %88 }
  0x88   :  { %v97_v49 = vmax.f32 %v81_v43, %v89_v48  ;;  %v87_v50 = vpop.permute.xlu0 %86 }
  0x89   :  { %104 = vst.msk [vmem:[#allocation2 + $0x8] sm:$0xff] %vm102_vm2, %v99_v47  ;;  %v115_v51 = vsel %vm102_vm2, %v99_v47, 0.0  ;;  %v96_v52 = vmax.f32 %v80_v46, %v87_v50 }
  0x8a   :  { %v101_v53 = vsub.f32 1.0, %v97_v49  ;;  %v116_v56 = vadd.f32 %v115_v51, %v114_v54 }
  0x8b   :  { %v100_v55 = vsub.f32 1.0, %v96_v52 }
  0x8c   :  { %106 = vst.msk [vmem:[#allocation2 + $0x18] sm:$0xff] %vm102_vm2, %v101_v53  ;;  %v119_v59 = vsel %vm102_vm2, %v101_v53, 0.0 }
  0x8d   :  { %105 = vst.msk [vmem:[#allocation2 + $0x10] sm:$0xff] %vm102_vm2, %v100_v55  ;;  %v117_v57 = vsel %vm102_vm2, %v100_v55, 0.0 }
  0x8e   :  { %v118_v58 = vadd.f32 %v117_v57, %v116_v56 }
  0x90   :  { %v120_v60 = vadd.f32 %v119_v59, %v118_v58 }
  0x92   :  { %121 = vadd.xlane.f32.xlu0 %v120_v60 }
  0x93   :  { %194 = shalt.err (!%p191_p4)
}
  0x94   :  { %s195_s27 = scalar_lea.hbm %s315_s1, 512 }
  0x95   :  { %p196_p5 = scmp.ne.s32.totalorder %s315_s1, %s195_s27  ;;  %p199_p6 = scmp.lt.u32.totalorder %s195_s27, %s315_s1 }
  0x97   :  { %p201_p7 = pnand %p199_p6, %p196_p5 }
  0x99   :  { %204 = shalt.err (!%p201_p7)
}
  0x9a   :  { %s235_s4 = smov 128   ;;  %s236_s5 = smov 8   ;;  %v113_v5 = vld [vmem:[#allocation4] sm:$0x1] }
  0x9b   :  { %153 = dma.vmem_to_hbm [thread:$0]  %s148_s23, 512, %s315_s1, [#allocation3], %s235_s4, %s235_s4, %s236_s5  }
  0x9c   :  { %s237_s9 = smov [#allocation4]  }
  0x9d   :  { %s160_s10 = sshll.u32 %s237_s9, 4  ;;  %s161_s10 = int_to_ptr.vmem [resolvable:$true] %s160_s10 }
  0x9e   :  { %s205_s1 = scalar_lea.vmem %s161_s10, 16  ;;  %s209_s11 = scalar_lea.vmem %s161_s10, 32 }
  0x9f   :  { %p206_p8 = scmp.ne.s32.totalorder %s161_s10, %s205_s1  ;;  %p210_p9 = scmp.lt.s32.totalorder %s161_s10, %s161_s10 }
  0xa0   :  { %p211_p10 = scmp.lt.s32.totalorder %s209_s11, %s205_s1 }
  0xa2   :  { %p212_p11 = por %p211_p10, %p210_p9 }
  0xa4   :  { %p213_p12 = pnand %p212_p11, %p206_p8 }
 0x11f   :  { %v122_v62 = vpop.xlane.xlu0 %121 }
 0x120   :  { %v123_v63 = vrot.slane %v122_v62, 4 }
 0x122   :  { %v124_v0 = vadd.f32 %v123_v63, %v122_v62 }
 0x124   :  { %v125_v1 = vrot.slane %v124_v0, 2 }
 0x126   :  { %v126_v2 = vadd.f32 %v125_v1, %v124_v0 }
 0x128   :  { %v127_v3 = vrot.slane %v126_v2, 1 }
 0x12a   :  { %v128_v4 = vadd.f32 %v127_v3, %v126_v2 }
 0x12c   :  { %172 = vpush %v128_v4 }
 0x15d   :  { %s173_s8 = spop %172 }
 0x15e   :  { %v130_v6 = vstv %s173_s8 }
 0x15f   :  { %v131_v7 = vadd.f32 %v130_v6, %v113_v5 }
 0x161   :  { %133 = vst.msk [vmem:[#allocation4] sm:$0x1] %vm111_vm3, %v131_v7 }
 0x168   :  { %v137_v8 = vld [vmem:[#allocation4] sm:$0x1] }
 0x169   :  { %v138_v9 = vmax.f32 %v137_v8, 1.0 }
 0x16b   :  { %181 = vrcp.f32 %v138_v9 }
 0x175   :  { %v182_v10 = vpop.eup %181 }
 0x176   :  { %v140_v11 = vmul.f32 512.0, %v182_v10 }
 0x178   :  { %141 = vst.msk [vmem:[#allocation4] sm:$0x1] %vm111_vm3, %v140_v11 }
 0x179   :  { %216 = shalt.err (!%p213_p12)
}
 0x17a   :  { %s217_s14 = scalar_lea.hbm %s316_s2, 16 }
 0x17b   :  { %p218_p13 = scmp.ne.s32.totalorder %s316_s2, %s217_s14  ;;  %p221_p0 = scmp.lt.u32.totalorder %s217_s14, %s316_s2 }
 0x17d   :  { %p223_p1 = pnand %p221_p0, %p218_p13 }
 0x17f   :  { %226 = shalt.err (!%p223_p1)
}
 0x180   :  { %163 = dma.vmem_to_hbm [thread:$0]  %s161_s10, 16, %s316_s2, [#allocation5]  }
 0x181   :  { %227 = dma.done.wait [#allocation3], 512  }
 0x182   :  { %228 = vsyncadd [#allocation3], 4294966784 }
 0x183   :  { %229 = dma.done.wait [#allocation5], 16  }
 0x184   :  { %230 = vsyncadd [#allocation5], 4294967280 }
 0x185   :  { %170 = vsyncpa [#allocation3], 1 }
 0x186   :  { %171 = vsyncpa [#allocation5], 1 }

</bundles_post_ra>
